<compile_context>
chip_gen: v6e
topology: v6e:2x2x1
jax: 0.10.0
libtpu: 0.0.40
codegen_flags: <defaults>
</compile_context>

<pallas_src>
import functools

import jax
import jax.numpy as jnp
from jax.experimental import pallas as pl
from jax.experimental.pallas import tpu as pltpu


def tiny_mlp_kernel_vec_out(x_ref, p_ref, b2_ref, o_ref, *, d_in):
    """D_out == 1 path.

    x_ref : (B, D_in + 2)   -- [x | 1 | 0]  (ones column picks up b1,
                                zeros column nulls the packed w2 row)
    p_ref : (D_in + 2, H)   -- rows 0:D_in = W1_eff.T, row D_in = b1_eff,
                                row D_in+1 = w2 row
    b2_ref: (1,) in SMEM    -- output bias scalar
    """
    # Layer 1: one fused MXU matmul (normalization + b1 already folded in).
    h = jnp.dot(x_ref[...], p_ref[...], preferred_element_type=jnp.float32)
    h = jax.nn.sigmoid(h)

    # Layer 2 (D_out == 1): VPU multiply + XLU lane reduction instead of a
    # wasteful 1-wide MXU matmul.  w2 row is a static 1-row slice of the
    # packed tile (layout-free).
    w2_row = p_ref[d_in + 1 : d_in + 2, :]                    # (1, H)
    y = jnp.sum(h * w2_row, axis=-1, keepdims=True) + b2_ref[0]
    o_ref[...] = y.astype(o_ref.dtype)


def tiny_mlp_kernel_general(x_ref, p_ref, w2t_ref, b2_ref, o_ref):
    """General D_out > 1 path (not used for nodes=[16,32,1], kept for safety).

    x_ref : (B, D_in + 1)   -- [x | 1]
    p_ref : (D_in + 1, H)   -- rows 0:D_in = W1_eff.T, row D_in = b1_eff
    w2t_ref: (H, D_out), b2_ref: (1, D_out)
    """
    h = jnp.dot(x_ref[...], p_ref[...], preferred_element_type=jnp.float32)
    h = jax.nn.sigmoid(h)
    y = jnp.dot(h, w2t_ref[...], preferred_element_type=jnp.float32) + b2_ref[...]
    o_ref[...] = y.astype(o_ref.dtype)


def tiny_mlp_forward(x, x_mean, x_std, w1, b1, w2, b2):
    """Fused TinyMlp forward pass.

    x: (B, D_in) float32
    x_mean, x_std: (D_in,) float32   (std is unbiased, like torch.std)
    w1: (H, D_in), b1: (H,), w2: (D_out, H), b2: (D_out,)   (nn.Linear layout)
    """
    B, D_in = x.shape
    H = w1.shape[0]
    D_out = w2.shape[0]

    # ---- Host-side prep (f32): fold normalization + b1 into layer 1, pack
    # all small parameters into one operand.
    inv_std = (1.0 / x_std).astype(jnp.float32)                    # (D_in,)
    w1t_eff = (w1 * inv_std[None, :]).T                            # (D_in, H)
    b1_eff = (b1 - (x_mean * inv_std) @ w1.T).reshape(1, H)        # (1, H)

    full = lambda shape: pl.BlockSpec(shape, lambda: tuple(0 for _ in shape))

    if D_out == 1:
        # x augmented with [ones | zeros]: ones column applies b1_eff, zeros
        # column nulls the packed w2 row, so the full packed tile feeds the
        # matmul with no in-kernel sub-slice.
        x_aug = jnp.concatenate(
            [x, jnp.ones((B, 1), x.dtype), jnp.zeros((B, 1), x.dtype)], axis=1
        )                                                          # (B, D_in+2)
        packed = jnp.concatenate(
            [w1t_eff, b1_eff, w2.reshape(1, H)], axis=0
        )                                                          # (D_in+2, H)
        kernel = functools.partial(tiny_mlp_kernel_vec_out, d_in=D_in)
        in_specs = [
            full((B, D_in + 2)),                                   # x_aug
            full((D_in + 2, H)),                                   # packed params
            pl.BlockSpec(memory_space=pltpu.MemorySpace.SMEM),     # b2 scalar
        ]
        args = (x_aug, packed, b2.reshape(1).astype(jnp.float32))
    else:
        x_aug = jnp.concatenate([x, jnp.ones((B, 1), x.dtype)], axis=1)
        packed = jnp.concatenate([w1t_eff, b1_eff], axis=0)        # (D_in+1, H)
        kernel = tiny_mlp_kernel_general
        in_specs = [
            full((B, D_in + 1)),
            full((D_in + 1, H)),
            full((H, D_out)),                                      # pre-transposed W2
            full((1, D_out)),
        ]
        args = (x_aug, packed, w2.T, b2.reshape(1, D_out))

    # TODO(synk): for large batches, add a batch grid axis marked "parallel"
    # (v7x has 2 TensorCores), use a >=512-row x tile, keep the packed-param
    # BlockSpec index_map constant across the batch axis so it stays
    # VMEM-resident, emit a lane-dense (D_out, B) output slab, and size
    # vmem_limit_bytes against v7x's 64 MiB VMEM / v5e's 16 MiB scoped limit.
    # For tiny batches a plain jitted XLA expression beats the custom-call
    # overhead; this pallas path is intended as the large-batch kernel.
    return pl.pallas_call(
        kernel,
        out_shape=jax.ShapeDtypeStruct((B, D_out), jnp.float32),
        grid=(),
        in_specs=in_specs,
        out_specs=full((B, D_out)),
    )(*args)


def reference_forward(x, x_mean, x_std, w1, b1, w2, b2):
    xn = (x - x_mean) / x_std
    h = jax.nn.sigmoid(xn @ w1.T + b1)
    return h @ w2.T + b2


if __name__ == "__main__":
    key = jax.random.PRNGKey(0)

    # nodes = [16, 32, 1]  -> Linear(16, 32) + Sigmoid + Linear(32, 1)
    B, D_in, H, D_out = 8, 16, 32, 1

    k_x, k_w1, k_b1, k_w2, k_b2 = jax.random.split(key, 5)

    x = jax.random.normal(k_x, (B, D_in), dtype=jnp.float32)

    # Normalization stats from the reference data (torch.std is unbiased, ddof=1).
    x_mean = jnp.mean(x, axis=0)
    x_std = jnp.std(x, axis=0, ddof=1)

    # Deterministic synthetic parameters (shapes follow nn.Linear).
    w1 = jax.random.uniform(k_w1, (H, D_in), jnp.float32, -0.25, 0.25)
    b1 = jax.random.uniform(k_b1, (H,), jnp.float32, -0.25, 0.25)
    w2 = jax.random.uniform(k_w2, (D_out, H), jnp.float32, -0.17, 0.17)
    b2 = jax.random.uniform(k_b2, (D_out,), jnp.float32, -0.17, 0.17)

    out = tiny_mlp_forward(x, x_mean, x_std, w1, b1, w2, b2)
    out = jax.block_until_ready(out)

    ref = reference_forward(x, x_mean, x_std, w1, b1, w2, b2)
    assert out.shape == (B, D_out)
    assert jnp.allclose(out, ref, atol=1e-5, rtol=1e-5)

    print("KERNEL_OK")
</pallas_src>

<mosaic_0001>
module attributes {stable_mosaic.version = 11 : i64} {
  func.func @tiny_mlp_kernel_vec_out(%arg0: memref<8x18xf32, #tpu.memory_space<vmem>>, %arg1: memref<18x32xf32, #tpu.memory_space<vmem>>, %arg2: memref<1xf32, #tpu.memory_space<smem>>, %arg3: memref<8x1xf32, #tpu.memory_space<vmem>>) attributes {dimension_semantics = [], scalar_prefetch = 0 : i64, scratch_operands = 0 : i64, tpu.core_type = #tpu.core_type<tc>} {
    %c0 = arith.constant 0 : index
    %c0_0 = arith.constant 0 : index
    %0 = vector.load %arg0[%c0, %c0_0] : memref<8x18xf32, #tpu.memory_space<vmem>>, vector<8x18xf32>
    %c0_1 = arith.constant 0 : index
    %c0_2 = arith.constant 0 : index
    %1 = vector.load %arg1[%c0_1, %c0_2] : memref<18x32xf32, #tpu.memory_space<vmem>>, vector<18x32xf32>
    %cst = arith.constant dense<0.000000e+00> : vector<8x32xf32>
    %2 = tpu.matmul %0, %1, %cst {dimension_numbers = #tpu.dot_dimension_numbers<[1], [0], [0], [1], [0, 0, 1, 1], [], []>} : vector<8x18xf32>, vector<18x32xf32>, vector<8x32xf32> -> vector<8x32xf32>
    %3 = arith.negf %2 : vector<8x32xf32>
    %4 = math.exp %3 : vector<8x32xf32>
    %cst_3 = arith.constant 1.000000e+00 : f32
    %5 = vector.broadcast %cst_3 : f32 to vector<8x32xf32>
    %6 = arith.addf %5, %4 : vector<8x32xf32>
    %7 = arith.divf %5, %6 : vector<8x32xf32>
    %c17 = arith.constant 17 : index
    %c0_4 = arith.constant 0 : index
    %8 = vector.load %arg1[%c17, %c0_4] : memref<18x32xf32, #tpu.memory_space<vmem>>, vector<1x32xf32>
    %9 = vector.broadcast %8 : vector<1x32xf32> to vector<8x32xf32>
    %10 = arith.mulf %7, %9 : vector<8x32xf32>
    %cst_5 = arith.constant dense<0.000000e+00> : vector<8xf32>
    %11 = vector.multi_reduction <add>, %10, %cst_5 [1] : vector<8x32xf32> to vector<8xf32>
    %12 = vector.shape_cast %11 : vector<8xf32> to vector<8x1xf32>
    %c0_6 = arith.constant 0 : index
    %13 = memref.load %arg2[%c0_6] : memref<1xf32, #tpu.memory_space<smem>>
    %14 = vector.broadcast %13 : f32 to vector<8x1xf32>
    %15 = arith.addf %12, %14 : vector<8x1xf32>
    %c0_7 = arith.constant 0 : index
    %c0_8 = arith.constant 0 : index
    %16 = vector.load %arg3[%c0_7, %c0_8] : memref<8x1xf32, #tpu.memory_space<vmem>>, vector<8x1xf32>
    tpu.vector_store %arg3[%c0_7, %c0_8], %15 {strides = array<i32>} : memref<8x1xf32, #tpu.memory_space<vmem>>, vector<8x1xf32>,
    return
  }
}

</mosaic_0001>

<bundles_post_ra>
// kernel: tpu_custom_call.1
= control target key start
LH: loop header
LB: loop body
LE: loop exit
PB: predicated region body
PF: predicated region fallthrough
CT: control target
= control target key end

     0   :  { %9 = vsyncpa [#allocation4], 0  ;;  %s259_s0 = inlined_call_operand.hbm [shape: f32[8,18], index: 0, kind: input, shape index: {}]   ;;  %s260_s1 = inlined_call_operand.hbm [shape: f32[18,32], index: 1, kind: input, shape index: {}]   ;;  %s261_s2 = inlined_call_operand.<no memory space> [shape: f32[1], index: 2, kind: input, shape index: {}]   ;;  %s262_s3 = inlined_call_operand.vmem [shape: f32[8,1], index: 3, kind: output, shape index: {}]  }
   0x1   :  { %10 = vsyncpa [#allocation6], 0  ;;  %s221_s12 = smov [#allocation3]   ;;  %s222_s14 = smov [#allocation5]  }
   0x2   :  { %s17_s13 = sshll.u32 %s221_s12, 4  ;;  %s26_s15 = sshll.u32 %s222_s14, 4  ;;  %s18_s13 = int_to_ptr.vmem [resolvable:$true] %s17_s13  ;;  %s27_s15 = int_to_ptr.vmem [resolvable:$true] %s26_s15 }
   0x3   :  { %s185_s16 = scalar_lea.vmem %s18_s13, 128  ;;  %p190_p1 = scmp.lt.s32.totalorder %s18_s13, %s18_s13 }
   0x4   :  { %p186_p0 = scmp.ne.s32.totalorder %s18_s13, %s185_s16  ;;  %p191_p2 = scmp.lt.s32.totalorder %s185_s16, %s185_s16 }
   0x6   :  { %p192_p3 = por %p191_p2, %p190_p1 }
   0x8   :  { %p193_p4 = pnand %p192_p3, %p186_p0 }
   0xa   :  { %196 = shalt.err (!%p193_p4)
}
   0xb   :  { %20 = dma.hbm_to_vmem [thread:$0]  %s259_s0, 128, %s18_s13, [#allocation4]  }
   0xc   :  { %s205_s19 = scalar_lea.vmem %s27_s15, 384  ;;  %p210_p6 = scmp.lt.s32.totalorder %s27_s15, %s27_s15 }
   0xd   :  { %p206_p5 = scmp.ne.s32.totalorder %s27_s15, %s205_s19  ;;  %p211_p7 = scmp.lt.s32.totalorder %s205_s19, %s205_s19 }
   0xf   :  { %p212_p8 = por %p211_p7, %p210_p6 }
  0x11   :  { %p213_p9 = pnand %p212_p8, %p206_p5 }
  0x13   :  { %216 = shalt.err (!%p213_p9)
}
  0x14   :  { %s223_s20 = smov 128   ;;  %s224_s21 = smov 8  }
  0x15   :  { %32 = dma.hbm_to_vmem [thread:$0]  %s260_s1, 384, %s27_s15, [#allocation6], %s223_s20, %s223_s20, %s224_s21  }
  0x16   :  { %217 = dma.done.wait [#allocation4], 128  }
  0x17   :  { %218 = vsyncadd [#allocation4], 4294967168 }
  0x18   :  { %219 = dma.done.wait [#allocation6], 384  }
  0x19   :  { %220 = vsyncadd [#allocation6], 4294966912  ;;  %v225_v0 = vmov 0.0   ;;  %vm226_vm0 = vmmov 0   ;;  %vm49_vm1 = vcmask 1041408   ;;  %v43_v2 = vld [vmem:[#allocation5 + $0x8] sm:$0xff]  ;;  %v140_v14 = vstv %s261_s2 }
  0x1a   :  { %158 = vmatprep.subr.mxu0 %v225_v0  ;;  %164 = vmatprep.mubr.msk.f32.mxu0 %vm226_vm0, %v225_v0  ;;  %v44_v1 = vld [vmem:[#allocation5 + $0x10] sm:$0x3]  ;;  %v42_v3 = vld [vmem:[#allocation5] sm:$0xff]  ;;  %v41_v4 = vld [vmem:[#allocation3] sm:$0xff]  ;;  %vm45_vm2 = vcmask 146432   ;;  %vm135_vm3 = vcmask 261120  }
  0x1b   :  { %159 = vmatpush3.msk.msra.mxu0 %vm49_vm1, %v44_v1  ;;  %v153_v10 = vld [vmem:[#allocation5 + $0x11] ss:$0 sm:$0xff]  ;;  %vm142_vm4 = vcmask 7168  }
  0x1c   :  { %160 = vmatprep.subr.mxu0 %v225_v0 }
  0x1d   :  { %161 = vmatpush3.msra.mxu0 %v43_v2 }
  0x1e   :  { %162 = vmatprep.subr.mxu0 %v225_v0 }
  0x1f   :  { %163 = vmatpush3.msra.mxu0 %v42_v3 }
  0x20   :  { %165 = vmatmul.mubr.msk.f32.vlgmr.msra.gmra.mxu0 %vm45_vm2, %v41_v4 }
  0xe0   :  { %v119_v5 = vpop.f32.mrf.mxu0 }
  0xe1   :  { %v152_v6 = vmul.f32 -1.442695, %v119_v5 }
  0xe2   :  { %v166_v7 = vpop.f32.mrf.mxu0 }
  0xe3   :  { %173 = vpow2.f32 %v152_v6 }
  0xf0   :  { %v174_v8 = vpop.eup %173 }
  0xf1   :  { %v126_v9 = vadd.f32 1.0, %v174_v8 }
  0xf3   :  { %175 = vrcp.f32 %v126_v9 }
 0x100   :  { %v176_v11 = vpop.eup %175 }
 0x101   :  { %v134_v12 = vmul.f32 %v176_v11, %v153_v10 }
 0x103   :  { %v136_v13 = vsel %vm135_vm3, %v134_v12, 0.0 }
 0x104   :  { %137 = vadd.xlane.f32.xlu0 %v136_v13 }
 0x18d   :  { %v138_v15 = vpop.xlane.xlu0 %137 }
 0x18e   :  { %v141_v16 = vadd.f32 %v140_v14, %v138_v15 }
 0x190   :  { %143 = vst.msk [vmem:[%s262_s3] sm:$0xff] %vm142_vm4, %v141_v16 }
 0x191   :  { %148 = vsyncpa [#allocation4], 1 }
 0x192   :  { %149 = vsyncpa [#allocation6], 1 }

</bundles_post_ra>
